<compile_context>
chip_gen: v7x
topology: tpu7x:2x2x1
jax: 0.10.0
libtpu: 0.0.40
codegen_flags: <defaults>
</compile_context>

<pallas_src>
import functools
import math

import jax
import jax.numpy as jnp
from jax.experimental import pallas as pl
from jax.experimental.pallas import tpu as pltpu


def _round_up(x, m):
    return ((x + m - 1) // m) * m


def _pick_tile(n, cap, grain):
    """Largest power-of-two multiple of `grain` <= min(cap, round_up(n, grain))."""
    limit = min(cap, _round_up(n, grain))
    t = grain
    while t * 2 <= limit:
        t *= 2
    return t


def _vmem_limit_bytes():
    # v5e/v6e have 128 MiB VMEM per TensorCore; v7x only 64 MiB.  Stay under.
    try:
        kind = jax.devices()[0].device_kind.lower()
    except Exception:  # pragma: no cover - defensive
        kind = ""
    if "v5" in kind or "v6" in kind:
        return 64 * 1024 * 1024
    return 32 * 1024 * 1024


# ---------------------------------------------------------------------------
# Stage 1: support = x @ W  (tiny; computed once, lane-dense, compute_dtype out)
# ---------------------------------------------------------------------------
def _support_kernel(x_ref, w_ref, s_ref, *, compute_dtype):
    x = x_ref[...].astype(compute_dtype)
    w = w_ref[...].astype(compute_dtype)
    s_ref[...] = jnp.dot(
        x, w, preferred_element_type=jnp.float32
    ).astype(s_ref.dtype)


# ---------------------------------------------------------------------------
# Stage 2: out = adj @ support (+ bias), accumulated directly into the f32
# output block (its index is constant over k, so it stays VMEM-resident).
# ---------------------------------------------------------------------------
def _make_aggregate_kernel(has_bias, support_resident, tk, compute_dtype):
    def kernel(*refs):
        if has_bias:
            b_ref, adj_ref, s_ref, o_ref = refs
        else:
            adj_ref, s_ref, o_ref = refs

        k = pl.program_id(1)

        @pl.when(k == 0)
        def _init():
            if has_bias:
                b = b_ref[...].astype(jnp.float32)
                if b.shape == o_ref.shape:
                    o_ref[...] = b
                else:  # (1, f_pad) bias broadcast over the row tile
                    o_ref[...] = jnp.broadcast_to(b, o_ref.shape)
            else:
                o_ref[...] = jnp.zeros_like(o_ref)

        if support_resident:
            start = pl.multiple_of(k * tk, tk)
            s_tile = s_ref[pl.ds(start, tk), :]
        else:
            s_tile = s_ref[...]

        # adj is cast in-kernel (no wrapper cast pass); MXU bf16 path, f32 acc.
        o_ref[...] += jnp.dot(
            adj_ref[...].astype(compute_dtype), s_tile,
            preferred_element_type=jnp.float32,
        )

    return kernel


def graph_convolution(x, adj, weight, bias=None, *,
                      row_tile=512, k_tile=512,
                      compute_dtype=jnp.bfloat16):
    """Pallas implementation of GraphConvolution.forward.

    x: (N, F_in) f32, adj: (N, N) f32 (or pre-cast bf16), weight: (F_in, F_out),
    bias: (N, F_out) or (F_out,) or None.  Returns (N, F_out) f32.
    compute_dtype=jnp.float32 gives exact module semantics (no bf16 streaming).
    """
    n, f_in = x.shape
    f_out = weight.shape[1]
    assert adj.shape == (n, n)
    assert weight.shape == (f_in, f_out)

    vmem_limit = _vmem_limit_bytes()
    cdt_bytes = jnp.dtype(compute_dtype).itemsize

    # Lane-dense feature dim (no masked vst / wasted MXU columns).
    f_pad = _round_up(f_out, 128)

    # Row tile (output rows) and contraction tile (adj cols / support rows),
    # padded independently.
    tm = _pick_tile(n, row_tile, 16)
    if n <= k_tile:
        tk = n                       # single reduction step, no column padding
    else:
        tk = _pick_tile(n, k_tile, 128)
    n_pad_m = _round_up(n, tm)
    n_pad_k = _round_up(n, tk)
    n_row_tiles = n_pad_m // tm
    n_k_tiles = n_pad_k // tk

    # ---- Bias handling (no dense zero bias is ever materialized). ----------
    has_bias = bias is not None
    if has_bias:
        if bias.ndim == 1:
            assert bias.shape == (f_out,)
            b_p = bias.reshape(1, f_out).astype(jnp.float32)
            if f_pad != f_out:
                b_p = jnp.pad(b_p, ((0, 0), (0, f_pad - f_out)))
            b_rows, b_index = 1, (lambda i, k: (0, 0))
        else:
            assert bias.shape == (n, f_out)
            b_p = bias.astype(jnp.float32)
            if n_pad_m != n or f_pad != f_out:
                b_p = jnp.pad(b_p, ((0, n_pad_m - n), (0, f_pad - f_out)))
            b_rows, b_index = tm, (lambda i, k: (i, 0))

    # ---- Stage 1: support = x @ W, computed once. ---------------------------
    x_p = x if n_pad_k == n else jnp.pad(x, ((0, n_pad_k - n), (0, 0)))
    w_p = weight if f_pad == f_out else jnp.pad(weight, ((0, 0), (0, f_pad - f_out)))
    tm1 = tk  # divides n_pad_k by construction

    support_p = pl.pallas_call(
        functools.partial(_support_kernel, compute_dtype=compute_dtype),
        out_shape=jax.ShapeDtypeStruct((n_pad_k, f_pad), compute_dtype),
        grid_spec=pltpu.PrefetchScalarGridSpec(
            num_scalar_prefetch=0,
            grid=(n_pad_k // tm1,),
            in_specs=[
                pl.BlockSpec((tm1, f_in), lambda i: (i, 0)),
                pl.BlockSpec((f_in, f_pad), lambda i: (0, 0)),
            ],
            out_specs=pl.BlockSpec((tm1, f_pad), lambda i: (i, 0)),
        ),
        compiler_params=pltpu.CompilerParams(
            dimension_semantics=("parallel",),
            vmem_limit_bytes=vmem_limit,
        ),
        cost_estimate=pl.CostEstimate(
            flops=2 * n_pad_k * f_in * f_pad,
            transcendentals=0,
            bytes_accessed=(x.dtype.itemsize * n_pad_k * f_in
                            + weight.dtype.itemsize * f_in * f_pad
                            + cdt_bytes * n_pad_k * f_pad),
        ),
    )(x_p, w_p)

    # ---- Stage 2: out = adj @ support (+ bias). -----------------------------
    # adj: pad only if required, NEVER cast in the wrapper (cast happens
    # in-kernel on the VMEM tile).
    if n_pad_m != n or n_pad_k != n:
        adj_p = jnp.pad(adj, ((0, n_pad_m - n), (0, n_pad_k - n)))
    else:
        adj_p = adj
    adj_bytes = adj.dtype.itemsize

    # Keep support fully VMEM-resident across k when it fits the budget
    # (assume default double-buffering on every operand).
    def _stage2_vmem(resident):
        sup = (n_pad_k if resident else tk) * f_pad * cdt_bytes
        total = 2 * (tm * tk * adj_bytes)            # adj tile stream
        total += 2 * sup                             # support
        total += 2 * (tm * f_pad * 4)                # resident f32 output block
        if has_bias:
            total += 2 * (b_rows * f_pad * 4)
        return total

    support_resident = (n_k_tiles > 1
                        and _stage2_vmem(True) <= int(0.7 * vmem_limit))

    in_specs = []
    inputs = []
    if has_bias:
        in_specs.append(pl.BlockSpec((b_rows, f_pad), b_index))
        inputs.append(b_p)
    in_specs.append(pl.BlockSpec((tm, tk), lambda i, k: (i, k)))          # adj
    inputs.append(adj_p)
    if support_resident:
        in_specs.append(pl.BlockSpec((n_pad_k, f_pad), lambda i, k: (0, 0)))
    else:
        in_specs.append(pl.BlockSpec((tk, f_pad), lambda i, k: (k, 0)))
    inputs.append(support_p)

    support_reads = 1 if support_resident else n_row_tiles
    out_p = pl.pallas_call(
        _make_aggregate_kernel(has_bias, support_resident, tk, compute_dtype),
        out_shape=jax.ShapeDtypeStruct((n_pad_m, f_pad), jnp.float32),
        grid_spec=pltpu.PrefetchScalarGridSpec(
            num_scalar_prefetch=0,
            grid=(n_row_tiles, n_k_tiles),
            in_specs=in_specs,
            out_specs=pl.BlockSpec((tm, f_pad), lambda i, k: (i, 0)),
        ),
        compiler_params=pltpu.CompilerParams(
            dimension_semantics=("parallel", "arbitrary"),
            vmem_limit_bytes=vmem_limit,
        ),
        cost_estimate=pl.CostEstimate(
            flops=2 * n_pad_m * n_pad_k * f_pad,
            transcendentals=0,
            bytes_accessed=(adj_bytes * n_pad_m * n_pad_k
                            + cdt_bytes * support_reads * n_pad_k * f_pad
                            + (4 * n_pad_m * f_pad if has_bias else 0)
                            + 4 * n_pad_m * f_pad),
        ),
    )(*inputs)

    # Strip padding back to the logical shape.
    return out_p[:n, :f_out]


if __name__ == "__main__":
    total_node, in_features, out_features = 64, 32, 16

    key = jax.random.PRNGKey(0)
    k_x, k_adj, k_w, k_b = jax.random.split(key, 4)

    # reset_parameters(): uniform(-stdv, stdv), stdv = 1/sqrt(out_features)
    stdv = 1.0 / math.sqrt(out_features)
    weight = jax.random.uniform(k_w, (in_features, out_features), jnp.float32,
                                minval=-stdv, maxval=stdv)
    bias = jax.random.uniform(k_b, (total_node, out_features), jnp.float32,
                              minval=-stdv, maxval=stdv)
    x = jax.random.normal(k_x, (total_node, in_features), jnp.float32)
    adj = jax.random.uniform(k_adj, (total_node, total_node), jnp.float32)

    out = jax.jit(graph_convolution)(x, adj, weight, bias)
    out = jax.block_until_ready(out)
    assert out.shape == (total_node, out_features)

    # Reference mirroring the kernel's deliberate bf16 compute path.
    support_q = jnp.dot(x.astype(jnp.bfloat16), weight.astype(jnp.bfloat16),
                        preferred_element_type=jnp.float32).astype(jnp.bfloat16)
    ref_q = jnp.dot(adj.astype(jnp.bfloat16), support_q,
                    preferred_element_type=jnp.float32) + bias
    assert jnp.allclose(out, ref_q, atol=1e-2, rtol=1e-2), \
        "mismatch vs bf16-stream reference"

    # Module semantics in full f32 (tolerance covers bf16 streaming of adj/support).
    ref = jnp.dot(adj, jnp.dot(x, weight)) + bias
    assert jnp.allclose(out, ref, atol=5e-2, rtol=5e-2), \
        "mismatch vs f32 module reference"

    # Exact-f32 compute path (opt-in) matches the module closely.
    out_f32 = jax.block_until_ready(
        jax.jit(functools.partial(graph_convolution, compute_dtype=jnp.float32))(
            x, adj, weight, bias))
    assert jnp.allclose(out_f32, ref, atol=1e-2, rtol=1e-2), \
        "mismatch on f32 compute path"

    # bias=None variant (module with bias=False).
    out_nb = jax.block_until_ready(jax.jit(graph_convolution)(x, adj, weight, None))
    assert jnp.allclose(out_nb, jnp.dot(adj, jnp.dot(x, weight)),
                        atol=5e-2, rtol=5e-2), "mismatch on bias=None path"

    print("KERNEL_OK")
</pallas_src>

<mosaic_0001>
module attributes {stable_mosaic.version = 11 : i64} {
  func.func @_support_kernel(%arg0: i32, %arg1: memref<64x32xf32, #tpu.memory_space<vmem>>, %arg2: memref<32x128xf32, #tpu.memory_space<vmem>>, %arg3: memref<64x128xbf16, #tpu.memory_space<vmem>>) attributes {dimension_semantics = [#tpu.dimension_semantics<parallel>], iteration_bounds = array<i64: 1>, scalar_prefetch = 0 : i64, scratch_operands = 0 : i64, tpu.core_type = #tpu.core_type<tc>, window_params = [{transform_indices = @transform_0, window_bounds = array<i64: 64, 32>}, {pipeline_mode = #tpu.pipeline_mode<synchronous>, transform_indices = @transform_1, window_bounds = array<i64: 32, 128>}, {transform_indices = @transform_2, window_bounds = array<i64: 64, 128>}]} {
    %c0 = arith.constant 0 : index
    %c0_0 = arith.constant 0 : index
    %0 = vector.load %arg1[%c0, %c0_0] : memref<64x32xf32, #tpu.memory_space<vmem>>, vector<64x32xf32>
    %1 = arith.truncf %0 : vector<64x32xf32> to vector<64x32xbf16>
    %c0_1 = arith.constant 0 : index
    %c0_2 = arith.constant 0 : index
    %2 = vector.load %arg2[%c0_1, %c0_2] : memref<32x128xf32, #tpu.memory_space<vmem>>, vector<32x128xf32>
    %3 = arith.truncf %2 : vector<32x128xf32> to vector<32x128xbf16>
    %cst = arith.constant dense<0.000000e+00> : vector<64x128xf32>
    %4 = tpu.matmul %1, %3, %cst {dimension_numbers = #tpu.dot_dimension_numbers<[1], [0], [0], [1], [0, 0, 1, 1], [], []>} : vector<64x32xbf16>, vector<32x128xbf16>, vector<64x128xf32> -> vector<64x128xf32>
    %5 = arith.truncf %4 : vector<64x128xf32> to vector<64x128xbf16>
    %c0_3 = arith.constant 0 : index
    %c0_4 = arith.constant 0 : index
    %6 = vector.load %arg3[%c0_3, %c0_4] : memref<64x128xbf16, #tpu.memory_space<vmem>>, vector<64x128xbf16>
    tpu.vector_store %arg3[%c0_3, %c0_4], %5 {strides = array<i32>} : memref<64x128xbf16, #tpu.memory_space<vmem>>, vector<64x128xbf16>,
    return
  }
  func.func @transform_0(%arg0: i32) -> (i32, i32) {
    %c0_i32 = arith.constant 0 : i32
    %c0_i32_0 = arith.constant 0 : i32
    return %arg0, %c0_i32 : i32, i32
  }
  func.func @transform_1(%arg0: i32) -> (i32, i32) {
    %c0_i32 = arith.constant 0 : i32
    %c0_i32_0 = arith.constant 0 : i32
    %c0_i32_1 = arith.constant 0 : i32
    return %c0_i32, %c0_i32_0 : i32, i32
  }
  func.func @transform_2(%arg0: i32) -> (i32, i32) {
    %c0_i32 = arith.constant 0 : i32
    %c0_i32_0 = arith.constant 0 : i32
    return %arg0, %c0_i32 : i32, i32
  }
}

module attributes {stable_mosaic.version = 11 : i64} {
  func.func @kernel(%arg0: i32, %arg1: i32, %arg2: memref<64x128xf32, #tpu.memory_space<vmem>>, %arg3: memref<64x64xf32, #tpu.memory_space<vmem>>, %arg4: memref<64x128xbf16, #tpu.memory_space<vmem>>, %arg5: memref<64x128xf32, #tpu.memory_space<vmem>>) attributes {dimension_semantics = [#tpu.dimension_semantics<parallel>, #tpu.dimension_semantics<arbitrary>], iteration_bounds = array<i64: 1, 1>, scalar_prefetch = 0 : i64, scratch_operands = 0 : i64, tpu.core_type = #tpu.core_type<tc>, window_params = [{transform_indices = @transform_0, window_bounds = array<i64: 64, 128>}, {transform_indices = @transform_1, window_bounds = array<i64: 64, 64>}, {transform_indices = @transform_2, window_bounds = array<i64: 64, 128>}, {transform_indices = @transform_3, window_bounds = array<i64: 64, 128>}]} {
    %c0_i32 = arith.constant 0 : i32
    %0 = arith.cmpi eq, %arg1, %c0_i32 : i32
    %1 = arith.extui %0 : i1 to i32
    %c0_i32_0 = arith.constant 0 : i32
    %2 = arith.cmpi ne, %1, %c0_i32_0 : i32
    scf.if %2 {
      %c0_8 = arith.constant 0 : index
      %c0_9 = arith.constant 0 : index
      %10 = vector.load %arg2[%c0_8, %c0_9] : memref<64x128xf32, #tpu.memory_space<vmem>>, vector<64x128xf32>
      %c0_10 = arith.constant 0 : index
      %c0_11 = arith.constant 0 : index
      %11 = vector.load %arg5[%c0_10, %c0_11] : memref<64x128xf32, #tpu.memory_space<vmem>>, vector<64x128xf32>
      tpu.vector_store %arg5[%c0_10, %c0_11], %10 {strides = array<i32>} : memref<64x128xf32, #tpu.memory_space<vmem>>, vector<64x128xf32>,
    } else {
    }
    %c0 = arith.constant 0 : index
    %c0_1 = arith.constant 0 : index
    %3 = vector.load %arg4[%c0, %c0_1] : memref<64x128xbf16, #tpu.memory_space<vmem>>, vector<64x128xbf16>
    %c0_2 = arith.constant 0 : index
    %c0_3 = arith.constant 0 : index
    %4 = vector.load %arg5[%c0_2, %c0_3] : memref<64x128xf32, #tpu.memory_space<vmem>>, vector<64x128xf32>
    %c0_4 = arith.constant 0 : index
    %c0_5 = arith.constant 0 : index
    %5 = vector.load %arg3[%c0_4, %c0_5] : memref<64x64xf32, #tpu.memory_space<vmem>>, vector<64x64xf32>
    %6 = arith.truncf %5 : vector<64x64xf32> to vector<64x64xbf16>
    %cst = arith.constant dense<0.000000e+00> : vector<64x128xf32>
    %7 = tpu.matmul %6, %3, %cst {dimension_numbers = #tpu.dot_dimension_numbers<[1], [0], [0], [1], [0, 0, 1, 1], [], []>} : vector<64x64xbf16>, vector<64x128xbf16>, vector<64x128xf32> -> vector<64x128xf32>
    %8 = arith.addf %4, %7 : vector<64x128xf32>
    %c0_6 = arith.constant 0 : index
    %c0_7 = arith.constant 0 : index
    %9 = vector.load %arg5[%c0_6, %c0_7] : memref<64x128xf32, #tpu.memory_space<vmem>>, vector<64x128xf32>
    tpu.vector_store %arg5[%c0_6, %c0_7], %8 {strides = array<i32>} : memref<64x128xf32, #tpu.memory_space<vmem>>, vector<64x128xf32>,
    return
  }
  func.func @transform_0(%arg0: i32, %arg1: i32) -> (i32, i32) {
    %c0_i32 = arith.constant 0 : i32
    %c0_i32_0 = arith.constant 0 : i32
    return %arg0, %c0_i32 : i32, i32
  }
  func.func @transform_1(%arg0: i32, %arg1: i32) -> (i32, i32) {
    %c0_i32 = arith.constant 0 : i32
    return %arg0, %arg1 : i32, i32
  }
  func.func @transform_2(%arg0: i32, %arg1: i32) -> (i32, i32) {
    %c0_i32 = arith.constant 0 : i32
    %c0_i32_0 = arith.constant 0 : i32
    return %arg1, %c0_i32 : i32, i32
  }
  func.func @transform_3(%arg0: i32, %arg1: i32) -> (i32, i32) {
    %c0_i32 = arith.constant 0 : i32
    %c0_i32_0 = arith.constant 0 : i32
    return %arg0, %c0_i32 : i32, i32
  }
}

</mosaic_0001>

<bundles_post_ra>
// kernel: graph_convolution.2
= control target key start
LH: loop header
LB: loop body
LE: loop exit
PB: predicated region body
PF: predicated region fallthrough
CT: control target
= control target key end

     0   :  { %vm30_vm0 = vcmask 261120   ;;  %s284_s1 = inlined_call_operand.vmem [shape: f32[32,128], index: 1, kind: input, shape index: {}]   ;;  %s285_s0 = inlined_call_operand.vmem [shape: f32[64,32], index: 0, kind: input, shape index: {}]   ;;  %s286_s2 = inlined_call_operand.vmem [shape: bf16[64,128], index: 2, kind: output, shape index: {}]  }
   0x1   :  { %v24_v0 = vld [vmem:[%s284_s1] sm:$0xff]  ;;  %v25_v1 = vld [vmem:[%s284_s1 + $0x8] sm:$0xff]  ;;  %v26_v2 = vld [vmem:[%s284_s1 + $0x10] sm:$0xff] }
   0x2   :  { %v28_v3 = vpack.c.bf16 %v25_v1, %v24_v0  ;;  %v27_v4 = vld [vmem:[%s284_s1 + $0x18] sm:$0xff]  ;;  %v12_v5 = vld [vmem:[%s285_s0] sm:$0xff]  ;;  %v13_v6 = vld [vmem:[%s285_s0 + $0x8] sm:$0xff] }
   0x3   :  { %v29_v7 = vpack.c.bf16 %v27_v4, %v26_v2  ;;  %v20_v8 = vpack.c.bf16 %v13_v6, %v12_v5  ;;  %v16_v9 = vld [vmem:[%s285_s0 + $0x20] sm:$0xff]  ;;  %v17_v10 = vld [vmem:[%s285_s0 + $0x28] sm:$0xff]  ;;  %v14_v12 = vld [vmem:[%s285_s0 + $0x10] sm:$0xff] }
   0x4   :  { %201 = vmatprep.subr.bf16.mxu0 %v28_v3  ;;  %213 = vmatprep.subr.bf16.mxu1 %v28_v3  ;;  %v22_v11 = vpack.c.bf16 %v17_v10, %v16_v9  ;;  %v15_v13 = vld [vmem:[%s285_s0 + $0x18] sm:$0xff]  ;;  %v18_v14 = vld [vmem:[%s285_s0 + $0x30] sm:$0xff] }
   0x5   :  { %202 = vmatpush3.bf16.msra.mxu0 %v28_v3  ;;  %215 = vmatpush3.bf16.msra.mxu1 %v28_v3  ;;  %v19_v15 = vld [vmem:[%s285_s0 + $0x38] sm:$0xff]  ;;  %v21_v16 = vpack.c.bf16 %v15_v13, %v14_v12 }
   0x6   :  { %203 = vmatprep.subr.bf16.mxu0 %v29_v7  ;;  %214 = vmatprep.subr.bf16.mxu1 %v29_v7  ;;  %v23_v17 = vpack.c.bf16 %v19_v15, %v18_v14 }
   0x7   :  { %205 = vmatprep.mubr.msk.bf16.mxu0 %vm30_vm0, %v20_v8  ;;  %209 = vmatprep.mubr.msk.bf16.mxu1 %vm30_vm0, %v22_v11 }
   0x9   :  { %204 = vmatpush3.bf16.msra.mxu0 %v29_v7  ;;  %216 = vmatpush3.bf16.msra.mxu1 %v29_v7 }
   0xc   :  { %206 = vmatmul.mubr.msk.bf16.vlgmr.msra.gmra.mrb[0].mxu0 %vm30_vm0, %v21_v16  ;;  %210 = vmatmul.mubr.msk.bf16.vlgmr.msra.gmra.mrb[0].mxu1 %vm30_vm0, %v23_v17 }
  0xdf   :  { %v207_v18 = vpop.f32.mrb[0].mxu0  ;;  %v211_v19 = vpop.f32.mrb[0].mxu1 }
  0xe0   :  { %v77_v20 = vpop.f32.mrb[1].mxu0  ;;  %v93_v21 = vpop.f32.mrb[1].mxu1 }
  0xe1   :  { %v208_v22 = vpop.f32.mrb[2].mxu0  ;;  %v212_v23 = vpop.f32.mrb[2].mxu1 }
  0xe2   :  { %v180_v24 = vpack.c.bf16 %v208_v22, %v207_v18  ;;  %v190_v25 = vpack.c.bf16 %v212_v23, %v211_v19  ;;  %v80_v26 = vpop.f32.mrb[3].mxu0  ;;  %v96_v27 = vpop.f32.mrb[3].mxu1 }
  0xe3   :  { %v175_v28 = vpack.c.bf16 %v80_v26, %v77_v20  ;;  %v185_v29 = vpack.c.bf16 %v96_v27, %v93_v21 }
  0xe4   :  { %192 = vst [vmem:[%s286_s2 + $0x8] sm:$0xff] %v180_v24   ;;  %194 = vst [vmem:[%s286_s2 + $0x18] sm:$0xff] %v190_v25  }
  0xe5   :  { %176 = vst [vmem:[%s286_s2] sm:$0xff] %v175_v28   ;;  %193 = vst [vmem:[%s286_s2 + $0x10] sm:$0xff] %v185_v29  }

// kernel: graph_convolution.3
= control target key start
LH: loop header
LB: loop body
LE: loop exit
PB: predicated region body
PF: predicated region fallthrough
CT: control target
= control target key end

     0   :  { %vm87_vm0 = vcmask 523264   ;;  %s337_s2 = inlined_call_operand.vmem [shape: bf16[64,128], index: 2, kind: input, shape index: {}]   ;;  %s338_s1 = inlined_call_operand.vmem [shape: f32[64,64], index: 1, kind: input, shape index: {}]   ;;  %s339_s0 = inlined_call_operand.vmem [shape: f32[64,128], index: 0, kind: input, shape index: {}]   ;;  %s340_s3 = inlined_call_operand.vmem [shape: f32[64,128], index: 3, kind: output, shape index: {}]  }
   0x1   :  { %v225_v0 = vld [vmem:[%s337_s2] sm:$0xff]   ;;  %v226_v1 = vld [vmem:[%s337_s2 + $0x8] sm:$0xff]   ;;  %v227_v2 = vld [vmem:[%s337_s2 + $0x10] sm:$0xff]  }
   0x2   :  { %201 = vmatprep.subr.bf16.mxu0 %v225_v0  ;;  %217 = vmatprep.subr.bf16.mxu1 %v225_v0  ;;  %v51_v3 = vld [vmem:[%s338_s1] sm:$0xff]  ;;  %v52_v4 = vld [vmem:[%s338_s1 + $0x8] sm:$0xff]  ;;  %v228_v9 = vld [vmem:[%s337_s2 + $0x18] sm:$0xff]  }
   0x3   :  { %202 = vmatpush3.bf16.msra.mxu0 %v225_v0  ;;  %221 = vmatpush3.bf16.msra.mxu1 %v225_v0  ;;  %v55_v5 = vld [vmem:[%s338_s1 + $0x20] sm:$0xff]  ;;  %v59_v6 = vpack.c.bf16 %v52_v4, %v51_v3  ;;  %v56_v7 = vld [vmem:[%s338_s1 + $0x28] sm:$0xff]  ;;  %v53_v10 = vld [vmem:[%s338_s1 + $0x10] sm:$0xff] }
   0x4   :  { %203 = vmatprep.subr.bf16.mxu0 %v226_v1  ;;  %218 = vmatprep.subr.bf16.mxu1 %v226_v1  ;;  %v61_v8 = vpack.c.bf16 %v56_v7, %v55_v5  ;;  %v54_v11 = vld [vmem:[%s338_s1 + $0x18] sm:$0xff]  ;;  %v57_v12 = vld [vmem:[%s338_s1 + $0x30] sm:$0xff]  ;;  %v19_v18 = vld [vmem:[%s339_s0] sm:$0xff] }
   0x5   :  { %209 = vmatprep.mubr.msk.bf16.mxu0 %vm87_vm0, %v59_v6  ;;  %v58_v13 = vld [vmem:[%s338_s1 + $0x38] sm:$0xff]  ;;  %v60_v14 = vpack.c.bf16 %v54_v11, %v53_v10  ;;  %v21_v16 = vld [vmem:[%s339_s0 + $0x10] sm:$0xff]  ;;  %v23_v19 = vld [vmem:[%s339_s0 + $0x20] sm:$0xff] }
   0x6   :  { %213 = vmatprep.mubr.msk.bf16.mxu1 %vm87_vm0, %v61_v8  ;;  %v62_v15 = vpack.c.bf16 %v58_v13, %v57_v12  ;;  %v25_v17 = vld [vmem:[%s339_s0 + $0x30] sm:$0xff]  ;;  %v22_v22 = vld [vmem:[%s339_s0 + $0x18] sm:$0xff]  ;;  %v20_v28 = vld [vmem:[%s339_s0 + $0x8] sm:$0xff] }
   0x7   :  { %204 = vmatpush3.bf16.msra.mxu0 %v226_v1  ;;  %222 = vmatpush3.bf16.msra.mxu1 %v226_v1  ;;  %v26_v23 = vld [vmem:[%s339_s0 + $0x38] sm:$0xff]  ;;  %v24_v29 = vld [vmem:[%s339_s0 + $0x28] sm:$0xff] }
   0x8   :  { %205 = vmatprep.subr.bf16.mxu0 %v227_v2  ;;  %219 = vmatprep.subr.bf16.mxu1 %v227_v2 }
   0xb   :  { %206 = vmatpush3.bf16.msra.mxu0 %v227_v2  ;;  %223 = vmatpush3.bf16.msra.mxu1 %v227_v2 }
   0xc   :  { %207 = vmatprep.subr.bf16.mxu0 %v228_v9  ;;  %220 = vmatprep.subr.bf16.mxu1 %v228_v9 }
   0xf   :  { %208 = vmatpush3.bf16.msra.mxu0 %v228_v9  ;;  %224 = vmatpush3.bf16.msra.mxu1 %v228_v9 }
  0x12   :  { %210 = vmatmul.mubr.msk.bf16.vlgmr.msra.gmra.mrb[0].mxu0 %vm87_vm0, %v60_v14  ;;  %214 = vmatmul.mubr.msk.bf16.vlgmr.msra.gmra.mrb[0].mxu1 %vm87_vm0, %v62_v15 }
  0xe5   :  { %v211_v20 = vpop.f32.mrb[0].mxu0  ;;  %v215_v21 = vpop.f32.mrb[0].mxu1 }
  0xe6   :  { %v167_v24 = vadd.f32 %v211_v20, %v21_v16  ;;  %v171_v25 = vadd.f32 %v215_v21, %v25_v17  ;;  %v134_v26 = vpop.f32.mrb[1].mxu0  ;;  %v150_v27 = vpop.f32.mrb[1].mxu1 }
  0xe7   :  { %v165_v30 = vadd.f32 %v134_v26, %v19_v18  ;;  %v169_v31 = vadd.f32 %v150_v27, %v23_v19  ;;  %v212_v32 = vpop.f32.mrb[2].mxu0  ;;  %v216_v33 = vpop.f32.mrb[2].mxu1 }
  0xe8   :  { %175 = vst [vmem:[%s340_s3 + $0x10] sm:$0xff] %v167_v24  ;;  %179 = vst [vmem:[%s340_s3 + $0x30] sm:$0xff] %v171_v25  ;;  %v168_v34 = vadd.f32 %v212_v32, %v22_v22  ;;  %v172_v35 = vadd.f32 %v216_v33, %v26_v23  ;;  %v137_v36 = vpop.f32.mrb[3].mxu0  ;;  %v153_v37 = vpop.f32.mrb[3].mxu1 }
  0xe9   :  { %173 = vst [vmem:[%s340_s3] sm:$0xff] %v165_v30  ;;  %177 = vst [vmem:[%s340_s3 + $0x20] sm:$0xff] %v169_v31  ;;  %v166_v38 = vadd.f32 %v137_v36, %v20_v28  ;;  %v170_v39 = vadd.f32 %v153_v37, %v24_v29 }
  0xea   :  { %176 = vst [vmem:[%s340_s3 + $0x18] sm:$0xff] %v168_v34  ;;  %180 = vst [vmem:[%s340_s3 + $0x38] sm:$0xff] %v172_v35 }
  0xeb   :  { %174 = vst [vmem:[%s340_s3 + $0x8] sm:$0xff] %v166_v38  ;;  %178 = vst [vmem:[%s340_s3 + $0x28] sm:$0xff] %v170_v39 }

</bundles_post_ra>
